<compile_context>
chip_gen: v6e
topology: v6e:2x2x1
jax: 0.10.0
libtpu: 0.0.40
codegen_flags: <defaults>
</compile_context>

<pallas_src>
import numpy as np
import jax
import jax.numpy as jnp
from jax.experimental import pallas as pl
from jax.experimental.pallas import tpu as pltpu


# ---------------------------------------------------------------------------
# Pooling matrix (exact torch.nn.AdaptiveAvgPool2d floor/ceil windows),
# transposed for the channels-as-M layout:
#     pooled(Cout, enc*enc) = acc(Cout, Q) @ P(Q, enc*enc)
# q = y*Wp + x indexes the flattened padded-row frame; seam columns (x >= W)
# keep weight 0, so garbage conv values computed there never reach the output.
# ---------------------------------------------------------------------------
def _adaptive_pool_matrix_t(H, W, Wp, enc):
    Q = (H - 1) * Wp + W
    P = np.zeros((Q, enc * enc), dtype=np.float32)
    for i in range(enc):
        hs, he = (i * H) // enc, -(-((i + 1) * H) // enc)     # floor / ceil
        for j in range(enc):
            ws, we = (j * W) // enc, -(-((j + 1) * W) // enc)
            inv = 1.0 / float((he - hs) * (we - ws))
            for y in range(hs, he):
                for x in range(ws, we):
                    P[y * Wp + x, i * enc + j] = inv
    return jnp.asarray(P)


# ---------------------------------------------------------------------------
# Fused kernel: 3x3 conv (single K=27 MXU dot per image) + bias + ReLU +
# adaptive average pool.  One grid step == Bblk images.
# ---------------------------------------------------------------------------
def _make_fused_kernel(Wp, Q, Bblk, Cin, n_taps=9):
    offs = [dy * Wp + dx for dy in range(3) for dx in range(3)]

    def kernel(x_ref, w_ref, b_ref, p_ref, o_ref, stk_ref):
        # x_ref:   (Bblk, Cin, Hp*Wp)    bf16  padded images, spatial on lanes
        # w_ref:   (Cout, 27)            f32   tap-major flattened conv weights
        # b_ref:   (Cout, 1)             f32
        # p_ref:   (Q, enc*enc)          f32   adaptive-pool matrix
        # o_ref:   (Bblk, Cout, enc*enc) f32
        # stk_ref: (Bblk, 27, Q)         f32   VMEM im2col scratch (never HBM)

        # In-kernel im2col: 9 statically lane-shifted reads of the image block
        # (cheap lane rotates in this layout), upcast to f32 and stacked along
        # the K axis of a small VMEM scratch.
        for t in range(n_taps):
            stk_ref[:, t * Cin:(t + 1) * Cin, :] = (
                x_ref[:, :, offs[t]:offs[t] + Q].astype(jnp.float32))

        w = w_ref[...]
        b = b_ref[...]
        pool = p_ref[...]
        for bi in range(Bblk):
            # One K=27 dot per image -> lane-dense (Cout, Q) accumulator.
            acc = jnp.dot(w, stk_ref[bi], preferred_element_type=jnp.float32)
            acc = jnp.maximum(acc + b, 0.0)                    # bias + ReLU
            # Pooling epilogue as a K=Q matmul; the full-resolution feature
            # map never leaves VMEM and the result is already NCHW-ordered.
            o_ref[bi] = jnp.dot(acc, pool,
                                preferred_element_type=jnp.float32)

    return kernel


def _pick_batch_block(B, per_image_bytes, cap_bytes=4 * 1024 * 1024):
    """Largest divisor of B that is <= 8 and keeps the per-step VMEM small."""
    best = 1
    for d in range(1, min(B, 8) + 1):
        if B % d == 0 and d * per_image_bytes <= cap_bytes:
            best = d
    return best


def _encode_fused(images_nchw, weight, bias, enc):
    """images_nchw: (B, Cin, H, W) f32; weight: (Cout, Cin, 3, 3); bias: (Cout,).

    Returns (B, Cout, enc, enc) == Conv3x3(pad=1) -> ReLU -> AdaptiveAvgPool2d.
    """
    B, Cin, H, W = images_nchw.shape
    Cout = weight.shape[0]
    Hp, Wp = H + 2, W + 2
    Q = (H - 1) * Wp + W          # conv rows incl. zero-weighted seam columns

    # Channels-first layout needs NO transpose: zero-pad spatially, flatten
    # spatial onto lanes, cast to bf16 so the kernel's image DMA (the only
    # image-sized HBM traffic) is halved.
    x = jnp.pad(images_nchw, ((0, 0), (0, 0), (1, 1), (1, 1)))
    x = x.reshape(B, Cin, Hp * Wp).astype(jnp.bfloat16)

    # Tap-major flattened weights: w2[o, t*Cin + c] = weight[o, c, dy, dx],
    # t = dy*3 + dx  -- matches the im2col stacking order inside the kernel.
    w2 = jnp.transpose(weight, (0, 2, 3, 1)).reshape(Cout, 9 * Cin)
    w2 = w2.astype(jnp.float32)
    b2 = bias.reshape(Cout, 1).astype(jnp.float32)
    pool = _adaptive_pool_matrix_t(H, W, Wp, enc)             # (Q, enc*enc)

    per_image = (9 * Cin * Q * 4                 # f32 im2col scratch
                 + 2 * Cin * Hp * Wp * 2         # double-buffered bf16 image
                 + 2 * Cout * enc * enc * 4)     # double-buffered output
    Bblk = _pick_batch_block(B, per_image)

    kernel = _make_fused_kernel(Wp, Q, Bblk, Cin)

    out = pl.pallas_call(
        kernel,
        out_shape=jax.ShapeDtypeStruct((B, Cout, enc * enc), jnp.float32),
        grid_spec=pltpu.PrefetchScalarGridSpec(
            num_scalar_prefetch=0,
            grid=(B // Bblk,),
            in_specs=[
                pl.BlockSpec((Bblk, Cin, Hp * Wp), lambda g: (g, 0, 0)),
                # Grid-invariant index maps: these constants are DMA'd once.
                pl.BlockSpec((Cout, 9 * Cin), lambda g: (0, 0)),
                pl.BlockSpec((Cout, 1), lambda g: (0, 0)),
                pl.BlockSpec((Q, enc * enc), lambda g: (0, 0)),
            ],
            out_specs=pl.BlockSpec((Bblk, Cout, enc * enc),
                                   lambda g: (g, 0, 0)),
            scratch_shapes=[pltpu.VMEM((Bblk, 9 * Cin, Q), jnp.float32)],
        ),
        compiler_params=pltpu.CompilerParams(
            dimension_semantics=("parallel",),   # megacore over batch blocks
            vmem_limit_bytes=8 * 1024 * 1024,    # real footprint << 1 MiB
        ),
    )(x, w2, b2, pool)

    # Already NCHW-ordered: just split the pooled spatial axis.
    return out.reshape(B, Cout, enc, enc)


# ---------------------------------------------------------------------------
# Encoder (forward only; all params frozen, matching requires_grad=False).
# ---------------------------------------------------------------------------
class Encoder:
    # TODO(synk): `get_image_model(model_type)` returns an arbitrary pretrained
    # torchvision backbone; replaced here with a deterministic synthetic CNN.
    def __init__(self, model_type="synthetic", encoded_image_size=8,
                 encoder_dim=32, enable_fine_tuning=False, seed=0):
        self.enc_image_size = encoded_image_size
        self.encoder_dim = encoder_dim
        key = jax.random.PRNGKey(seed)
        kw, kb = jax.random.split(key)
        fan_in = 3 * 3 * 3
        self.conv_w = (jax.random.normal(kw, (encoder_dim, 3, 3, 3),
                                         dtype=jnp.float32)
                       / jnp.sqrt(float(fan_in)))
        self.conv_b = 0.01 * jax.random.normal(kb, (encoder_dim,),
                                               dtype=jnp.float32)

    def forward(self, images):
        """images: (B, 3, H, W) float32 -> (B, encoder_dim, enc, enc)."""
        return _encode_fused(images, self.conv_w, self.conv_b,
                             self.enc_image_size)

    __call__ = forward


# ---------------------------------------------------------------------------
# Pure-JAX reference (f32) for the correctness check in __main__.
# (H, W divisible by enc in the test -> simple reshape-mean pooling.)
# ---------------------------------------------------------------------------
def _reference_forward(images, weight, bias, enc):
    B, Cin, H, W = images.shape
    x = jnp.transpose(images, (0, 2, 3, 1))
    xp = jnp.pad(x, ((0, 0), (1, 1), (1, 1), (0, 0)))
    pats = jnp.stack([xp[:, dy:dy + H, dx:dx + W, :]
                      for dy in range(3) for dx in range(3)], axis=3)
    w_taps = jnp.transpose(weight, (2, 3, 1, 0)).reshape(9, Cin, weight.shape[0])
    f = jnp.einsum('bhwtc,tcd->bhwd', pats, w_taps) + bias
    f = jnp.maximum(f, 0.0)
    f = jnp.transpose(f, (0, 3, 1, 2))                        # (B, Cout, H, W)
    return f.reshape(B, weight.shape[0], enc, H // enc, enc, W // enc).mean(
        axis=(3, 5))


if __name__ == "__main__":
    key = jax.random.PRNGKey(0)
    images = jax.random.normal(key, (2, 3, 16, 16), dtype=jnp.float32)

    enc = Encoder(encoded_image_size=8, encoder_dim=32)
    out = jax.jit(enc.forward)(images)
    out = jax.block_until_ready(out)

    assert out.shape == (2, 32, 8, 8), out.shape
    assert bool(jnp.all(jnp.isfinite(out)))

    # Only the image itself is quantized to bf16 (for the HBM DMA); all MXU
    # inputs and accumulation are f32, so parity with the f32 reference is
    # tight (expected max error ~1e-2).
    ref = _reference_forward(images, enc.conv_w, enc.conv_b, enc.enc_image_size)
    max_err = float(jnp.max(jnp.abs(out - ref)))
    assert max_err < 5e-2, max_err

    print("KERNEL_OK")
</pallas_src>

<mosaic_0001>
module attributes {stable_mosaic.version = 11 : i64} {
  func.func @kernel(%arg0: i32, %arg1: memref<2x3x324xbf16, #tpu.memory_space<vmem>>, %arg2: memref<32x27xf32, #tpu.memory_space<vmem>>, %arg3: memref<32x1xf32, #tpu.memory_space<vmem>>, %arg4: memref<286x64xf32, #tpu.memory_space<vmem>>, %arg5: memref<2x32x64xf32, #tpu.memory_space<vmem>>, %arg6: memref<2x27x286xf32, #tpu.memory_space<vmem>>) attributes {dimension_semantics = [#tpu.dimension_semantics<parallel>], iteration_bounds = array<i64: 1>, scalar_prefetch = 0 : i64, scratch_operands = 1 : i64, tpu.core_type = #tpu.core_type<tc>, window_params = [{transform_indices = @transform_0, window_bounds = array<i64: 2, 3, 324>}, {pipeline_mode = #tpu.pipeline_mode<synchronous>, transform_indices = @transform_1, window_bounds = array<i64: 32, 27>}, {pipeline_mode = #tpu.pipeline_mode<synchronous>, transform_indices = @transform_2, window_bounds = array<i64: 32, 1>}, {pipeline_mode = #tpu.pipeline_mode<synchronous>, transform_indices = @transform_3, window_bounds = array<i64: 286, 64>}, {transform_indices = @transform_4, window_bounds = array<i64: 2, 32, 64>}]} {
    %c0 = arith.constant 0 : index
    %c0_0 = arith.constant 0 : index
    %c0_1 = arith.constant 0 : index
    %0 = vector.load %arg1[%c0, %c0_0, %c0_1] : memref<2x3x324xbf16, #tpu.memory_space<vmem>>, vector<2x3x286xbf16>
    %1 = arith.extf %0 : vector<2x3x286xbf16> to vector<2x3x286xf32>
    %c0_2 = arith.constant 0 : index
    %c0_3 = arith.constant 0 : index
    %c0_4 = arith.constant 0 : index
    %2 = vector.load %arg6[%c0_2, %c0_3, %c0_4] : memref<2x27x286xf32, #tpu.memory_space<vmem>>, vector<2x3x286xf32>
    tpu.vector_store %arg6[%c0_2, %c0_3, %c0_4], %1 {strides = array<i32>} : memref<2x27x286xf32, #tpu.memory_space<vmem>>, vector<2x3x286xf32>,
    %c0_5 = arith.constant 0 : index
    %c0_6 = arith.constant 0 : index
    %c1 = arith.constant 1 : index
    %3 = vector.load %arg1[%c0_5, %c0_6, %c1] : memref<2x3x324xbf16, #tpu.memory_space<vmem>>, vector<2x3x286xbf16>
    %4 = arith.extf %3 : vector<2x3x286xbf16> to vector<2x3x286xf32>
    %c0_7 = arith.constant 0 : index
    %c3 = arith.constant 3 : index
    %c0_8 = arith.constant 0 : index
    %5 = vector.load %arg6[%c0_7, %c3, %c0_8] : memref<2x27x286xf32, #tpu.memory_space<vmem>>, vector<2x3x286xf32>
    tpu.vector_store %arg6[%c0_7, %c3, %c0_8], %4 {strides = array<i32>} : memref<2x27x286xf32, #tpu.memory_space<vmem>>, vector<2x3x286xf32>,
    %c0_9 = arith.constant 0 : index
    %c0_10 = arith.constant 0 : index
    %c2 = arith.constant 2 : index
    %6 = vector.load %arg1[%c0_9, %c0_10, %c2] : memref<2x3x324xbf16, #tpu.memory_space<vmem>>, vector<2x3x286xbf16>
    %7 = arith.extf %6 : vector<2x3x286xbf16> to vector<2x3x286xf32>
    %c0_11 = arith.constant 0 : index
    %c6 = arith.constant 6 : index
    %c0_12 = arith.constant 0 : index
    %8 = vector.load %arg6[%c0_11, %c6, %c0_12] : memref<2x27x286xf32, #tpu.memory_space<vmem>>, vector<2x3x286xf32>
    tpu.vector_store %arg6[%c0_11, %c6, %c0_12], %7 {strides = array<i32>} : memref<2x27x286xf32, #tpu.memory_space<vmem>>, vector<2x3x286xf32>,
    %c0_13 = arith.constant 0 : index
    %c0_14 = arith.constant 0 : index
    %c18 = arith.constant 18 : index
    %9 = vector.load %arg1[%c0_13, %c0_14, %c18] : memref<2x3x324xbf16, #tpu.memory_space<vmem>>, vector<2x3x286xbf16>
    %10 = arith.extf %9 : vector<2x3x286xbf16> to vector<2x3x286xf32>
    %c0_15 = arith.constant 0 : index
    %c9 = arith.constant 9 : index
    %c0_16 = arith.constant 0 : index
    %11 = vector.load %arg6[%c0_15, %c9, %c0_16] : memref<2x27x286xf32, #tpu.memory_space<vmem>>, vector<2x3x286xf32>
    tpu.vector_store %arg6[%c0_15, %c9, %c0_16], %10 {strides = array<i32>} : memref<2x27x286xf32, #tpu.memory_space<vmem>>, vector<2x3x286xf32>,
    %c0_17 = arith.constant 0 : index
    %c0_18 = arith.constant 0 : index
    %c19 = arith.constant 19 : index
    %12 = vector.load %arg1[%c0_17, %c0_18, %c19] : memref<2x3x324xbf16, #tpu.memory_space<vmem>>, vector<2x3x286xbf16>
    %13 = arith.extf %12 : vector<2x3x286xbf16> to vector<2x3x286xf32>
    %c0_19 = arith.constant 0 : index
    %c12 = arith.constant 12 : index
    %c0_20 = arith.constant 0 : index
    %14 = vector.load %arg6[%c0_19, %c12, %c0_20] : memref<2x27x286xf32, #tpu.memory_space<vmem>>, vector<2x3x286xf32>
    tpu.vector_store %arg6[%c0_19, %c12, %c0_20], %13 {strides = array<i32>} : memref<2x27x286xf32, #tpu.memory_space<vmem>>, vector<2x3x286xf32>,
    %c0_21 = arith.constant 0 : index
    %c0_22 = arith.constant 0 : index
    %c20 = arith.constant 20 : index
    %15 = vector.load %arg1[%c0_21, %c0_22, %c20] : memref<2x3x324xbf16, #tpu.memory_space<vmem>>, vector<2x3x286xbf16>
    %16 = arith.extf %15 : vector<2x3x286xbf16> to vector<2x3x286xf32>
    %c0_23 = arith.constant 0 : index
    %c15 = arith.constant 15 : index
    %c0_24 = arith.constant 0 : index
    %17 = vector.load %arg6[%c0_23, %c15, %c0_24] : memref<2x27x286xf32, #tpu.memory_space<vmem>>, vector<2x3x286xf32>
    tpu.vector_store %arg6[%c0_23, %c15, %c0_24], %16 {strides = array<i32>} : memref<2x27x286xf32, #tpu.memory_space<vmem>>, vector<2x3x286xf32>,
    %c0_25 = arith.constant 0 : index
    %c0_26 = arith.constant 0 : index
    %c36 = arith.constant 36 : index
    %18 = vector.load %arg1[%c0_25, %c0_26, %c36] : memref<2x3x324xbf16, #tpu.memory_space<vmem>>, vector<2x3x286xbf16>
    %19 = arith.extf %18 : vector<2x3x286xbf16> to vector<2x3x286xf32>
    %c0_27 = arith.constant 0 : index
    %c18_28 = arith.constant 18 : index
    %c0_29 = arith.constant 0 : index
    %20 = vector.load %arg6[%c0_27, %c18_28, %c0_29] : memref<2x27x286xf32, #tpu.memory_space<vmem>>, vector<2x3x286xf32>
    tpu.vector_store %arg6[%c0_27, %c18_28, %c0_29], %19 {strides = array<i32>} : memref<2x27x286xf32, #tpu.memory_space<vmem>>, vector<2x3x286xf32>,
    %c0_30 = arith.constant 0 : index
    %c0_31 = arith.constant 0 : index
    %c37 = arith.constant 37 : index
    %21 = vector.load %arg1[%c0_30, %c0_31, %c37] : memref<2x3x324xbf16, #tpu.memory_space<vmem>>, vector<2x3x286xbf16>
    %22 = arith.extf %21 : vector<2x3x286xbf16> to vector<2x3x286xf32>
    %c0_32 = arith.constant 0 : index
    %c21 = arith.constant 21 : index
    %c0_33 = arith.constant 0 : index
    %23 = vector.load %arg6[%c0_32, %c21, %c0_33] : memref<2x27x286xf32, #tpu.memory_space<vmem>>, vector<2x3x286xf32>
    tpu.vector_store %arg6[%c0_32, %c21, %c0_33], %22 {strides = array<i32>} : memref<2x27x286xf32, #tpu.memory_space<vmem>>, vector<2x3x286xf32>,
    %c0_34 = arith.constant 0 : index
    %c0_35 = arith.constant 0 : index
    %c38 = arith.constant 38 : index
    %24 = vector.load %arg1[%c0_34, %c0_35, %c38] : memref<2x3x324xbf16, #tpu.memory_space<vmem>>, vector<2x3x286xbf16>
    %25 = arith.extf %24 : vector<2x3x286xbf16> to vector<2x3x286xf32>
    %c0_36 = arith.constant 0 : index
    %c24 = arith.constant 24 : index
    %c0_37 = arith.constant 0 : index
    %26 = vector.load %arg6[%c0_36, %c24, %c0_37] : memref<2x27x286xf32, #tpu.memory_space<vmem>>, vector<2x3x286xf32>
    tpu.vector_store %arg6[%c0_36, %c24, %c0_37], %25 {strides = array<i32>} : memref<2x27x286xf32, #tpu.memory_space<vmem>>, vector<2x3x286xf32>,
    %c0_38 = arith.constant 0 : index
    %c0_39 = arith.constant 0 : index
    %27 = vector.load %arg2[%c0_38, %c0_39] : memref<32x27xf32, #tpu.memory_space<vmem>>, vector<32x27xf32>
    %c0_40 = arith.constant 0 : index
    %c0_41 = arith.constant 0 : index
    %28 = vector.load %arg3[%c0_40, %c0_41] : memref<32x1xf32, #tpu.memory_space<vmem>>, vector<32x1xf32>
    %c0_42 = arith.constant 0 : index
    %c0_43 = arith.constant 0 : index
    %29 = vector.load %arg4[%c0_42, %c0_43] : memref<286x64xf32, #tpu.memory_space<vmem>>, vector<286x64xf32>
    %c0_44 = arith.constant 0 : index
    %c0_45 = arith.constant 0 : index
    %c0_46 = arith.constant 0 : index
    %30 = vector.load %arg6[%c0_44, %c0_45, %c0_46] : memref<2x27x286xf32, #tpu.memory_space<vmem>>, vector<1x27x286xf32>
    %31 = vector.shape_cast %30 : vector<1x27x286xf32> to vector<27x286xf32>
    %cst = arith.constant dense<0.000000e+00> : vector<32x286xf32>
    %32 = tpu.matmul %27, %31, %cst {dimension_numbers = #tpu.dot_dimension_numbers<[1], [0], [0], [1], [0, 0, 1, 1], [], []>} : vector<32x27xf32>, vector<27x286xf32>, vector<32x286xf32> -> vector<32x286xf32>
    %33 = vector.broadcast %28 : vector<32x1xf32> to vector<32x286xf32>
    %34 = arith.addf %32, %33 : vector<32x286xf32>
    %cst_47 = arith.constant 0.000000e+00 : f32
    %35 = vector.broadcast %cst_47 : f32 to vector<32x286xf32>
    %36 = arith.maximumf %34, %35 : vector<32x286xf32>
    %cst_48 = arith.constant dense<0.000000e+00> : vector<32x64xf32>
    %37 = tpu.matmul %36, %29, %cst_48 {dimension_numbers = #tpu.dot_dimension_numbers<[1], [0], [0], [1], [0, 0, 1, 1], [], []>} : vector<32x286xf32>, vector<286x64xf32>, vector<32x64xf32> -> vector<32x64xf32>
    %c0_49 = arith.constant 0 : index
    %c0_50 = arith.constant 0 : index
    %c0_51 = arith.constant 0 : index
    %38 = vector.load %arg5[%c0_49, %c0_50, %c0_51] : memref<2x32x64xf32, #tpu.memory_space<vmem>>, vector<1x32x64xf32>
    %39 = vector.shape_cast %38 : vector<1x32x64xf32> to vector<32x64xf32>
    %40 = vector.shape_cast %37 : vector<32x64xf32> to vector<1x32x64xf32>
    tpu.vector_store %arg5[%c0_49, %c0_50, %c0_51], %40 {strides = array<i32>} : memref<2x32x64xf32, #tpu.memory_space<vmem>>, vector<1x32x64xf32>,
    %c1_52 = arith.constant 1 : index
    %c0_53 = arith.constant 0 : index
    %c0_54 = arith.constant 0 : index
    %41 = vector.load %arg6[%c1_52, %c0_53, %c0_54] : memref<2x27x286xf32, #tpu.memory_space<vmem>>, vector<1x27x286xf32>
    %42 = vector.shape_cast %41 : vector<1x27x286xf32> to vector<27x286xf32>
    %cst_55 = arith.constant dense<0.000000e+00> : vector<32x286xf32>
    %43 = tpu.matmul %27, %42, %cst_55 {dimension_numbers = #tpu.dot_dimension_numbers<[1], [0], [0], [1], [0, 0, 1, 1], [], []>} : vector<32x27xf32>, vector<27x286xf32>, vector<32x286xf32> -> vector<32x286xf32>
    %44 = vector.broadcast %28 : vector<32x1xf32> to vector<32x286xf32>
    %45 = arith.addf %43, %44 : vector<32x286xf32>
    %cst_56 = arith.constant 0.000000e+00 : f32
    %46 = vector.broadcast %cst_56 : f32 to vector<32x286xf32>
    %47 = arith.maximumf %45, %46 : vector<32x286xf32>
    %cst_57 = arith.constant dense<0.000000e+00> : vector<32x64xf32>
    %48 = tpu.matmul %47, %29, %cst_57 {dimension_numbers = #tpu.dot_dimension_numbers<[1], [0], [0], [1], [0, 0, 1, 1], [], []>} : vector<32x286xf32>, vector<286x64xf32>, vector<32x64xf32> -> vector<32x64xf32>
    %c1_58 = arith.constant 1 : index
    %c0_59 = arith.constant 0 : index
    %c0_60 = arith.constant 0 : index
    %49 = vector.load %arg5[%c1_58, %c0_59, %c0_60] : memref<2x32x64xf32, #tpu.memory_space<vmem>>, vector<1x32x64xf32>
    %50 = vector.shape_cast %49 : vector<1x32x64xf32> to vector<32x64xf32>
    %51 = vector.shape_cast %48 : vector<32x64xf32> to vector<1x32x64xf32>
    tpu.vector_store %arg5[%c1_58, %c0_59, %c0_60], %51 {strides = array<i32>} : memref<2x32x64xf32, #tpu.memory_space<vmem>>, vector<1x32x64xf32>,
    return
  }
  func.func @transform_0(%arg0: i32) -> (i32, i32, i32) {
    %c0_i32 = arith.constant 0 : i32
    %c0_i32_0 = arith.constant 0 : i32
    %c0_i32_1 = arith.constant 0 : i32
    return %arg0, %c0_i32, %c0_i32_0 : i32, i32, i32
  }
  func.func @transform_1(%arg0: i32) -> (i32, i32) {
    %c0_i32 = arith.constant 0 : i32
    %c0_i32_0 = arith.constant 0 : i32
    %c0_i32_1 = arith.constant 0 : i32
    return %c0_i32, %c0_i32_0 : i32, i32
  }
  func.func @transform_2(%arg0: i32) -> (i32, i32) {
    %c0_i32 = arith.constant 0 : i32
    %c0_i32_0 = arith.constant 0 : i32
    %c0_i32_1 = arith.constant 0 : i32
    return %c0_i32, %c0_i32_0 : i32, i32
  }
  func.func @transform_3(%arg0: i32) -> (i32, i32) {
    %c0_i32 = arith.constant 0 : i32
    %c0_i32_0 = arith.constant 0 : i32
    %c0_i32_1 = arith.constant 0 : i32
    return %c0_i32, %c0_i32_0 : i32, i32
  }
  func.func @transform_4(%arg0: i32) -> (i32, i32, i32) {
    %c0_i32 = arith.constant 0 : i32
    %c0_i32_0 = arith.constant 0 : i32
    %c0_i32_1 = arith.constant 0 : i32
    return %arg0, %c0_i32, %c0_i32_0 : i32, i32, i32
  }
}

</mosaic_0001>

<bundles_post_ra>
// kernel: forward.1
= control target key start
LH: loop header
LB: loop body
LE: loop exit
PB: predicated region body
PF: predicated region fallthrough
CT: control target
= control target key end

     0   :  { %s1603_s23 = smov 90   ;;  %s1604_s28 = smov 108   ;;  %vm31_vm0 = vcmask 239616   ;;  %vm406_vm1 = vcmask 736256   ;;  %vm261_vm2 = vcmask 883712   ;;  %vm274_vm3 = vcmask 244743   ;;  %s2199_s0 = inlined_call_operand.vmem [shape: bf16[2,3,324], index: 0, kind: input, shape index: {}]   ;;  %s2200_s2 = inlined_call_operand.vmem [shape: f32[32,1], index: 2, kind: input, shape index: {}]   ;;  %s2201_s3 = inlined_call_operand.vmem [shape: f32[286,64], index: 3, kind: input, shape index: {}]   ;;  %s2202_s1 = inlined_call_operand.vmem [shape: f32[32,27], index: 1, kind: input, shape index: {}]   ;;  %s2203_s4 = inlined_call_operand.vmem [shape: f32[2,32,64], index: 4, kind: output, shape index: {}]  }
   0x1   :  { %v382_v0 = vld [vmem:[%s2199_s0] sm:$0x3f]  ;;  %v18_v38 = vld [vmem:[%s2199_s0 + $0x6] sm:$0x3f]  ;;  %s1605_s9 = smov 91   ;;  %s1606_s12 = smov 92  }
   0x2   :  { %v231_v1 = vld [vmem:[%s2199_s0] sm:$0x3f]  ;;  %v384_v3 = vunpack.c.l.bf16 %v382_v0  ;;  %v385_v4 = vunpack.c.h.bf16 %v382_v0  ;;  %v21_v48 = vunpack.c.l.bf16 %v18_v38  ;;  %v22_v50 = vunpack.c.h.bf16 %v18_v38  ;;  %s1607_s13 = smov 126   ;;  %s1608_s14 = smov 110  }
   0x3   :  { %v334_v2 = vld [vmem:[%s2199_s0] sm:$0x3f]  ;;  %v233_v5 = vunpack.c.l.bf16 %v231_v1  ;;  %v234_v6 = vunpack.c.h.bf16 %v231_v1  ;;  %s1609_s15 = smov 109   ;;  %s1611_s16 = smov 127   ;;  %vm278_vm4 = vcmask 238592   ;;  %vm377_vm5 = vcmask 244741  }
   0x4   :  { %v286_v7 = vld [vmem:[%s2199_s0] sm:$0x3f]  ;;  %v1650_v8 = vunpack.c.l.bf16 %v334_v2  ;;  %v337_v9 = vunpack.c.h.bf16 %v334_v2  ;;  %394 = vrot.lane.b32.xlu0 %v384_v3, %s1603_s23  ;;  %v392_v12 = vcombine.high %v384_v3, %v384_v3  ;;  %v26_v55 = vcombine.high %v21_v48, %v21_v48  ;;  %33 = vst [vmem:[#allocation2 + $0x60] sm:$0x7] %v21_v48  ;;  %35 = vst.msk [vmem:[#allocation2 + $0x70] sm:$0x7] %vm31_vm0, %v22_v50 }
   0x5   :  { %v288_v10 = vunpack.c.l.bf16 %v286_v7  ;;  %v289_v11 = vunpack.c.h.bf16 %v286_v7  ;;  %v243_v13 = vrot.slane %v233_v5, 1  ;;  %v241_v14 = vcombine.high %v233_v5, %v233_v5  ;;  %v84_v16 = vld [vmem:[%s2199_s0] sm:$0x3f]  ;;  %v429_v50 = vld [vmem:[%s2200_s2 + $0x10] sm:$0xff] }
   0x6   :  { %v245_v15 = vrot.slane %v234_v6, 1  ;;  %v344_v17 = vcombine.high %v1650_v8, %v1650_v8  ;;  %v348_v18 = vrot.slane %v337_v9, 3  ;;  %v139_v20 = vld [vmem:[%s2199_s0] sm:$0x3f]  ;;  %v1521_v21 = vpack.i.bf16 %v385_v4, %v392_v12  ;;  %34 = vst [vmem:[#allocation2 + $0x68] sm:$0x7] %v26_v55 }
   0x7   :  { %v296_v19 = vcombine.high %v288_v10, %v288_v10  ;;  %249 = vrot.lane.b32.xlu1 %v243_v13, %s1604_s28  ;;  %v244_v22 = vrot.slane %v241_v14, 1  ;;  %v300_v23 = vrot.slane %v289_v11, 6  ;;  %v86_v26 = vunpack.c.l.bf16 %v84_v16  ;;  %v187_v32 = vld [vmem:[%s2199_s0] sm:$0x3f]  ;;  %v383_v4 = vld [vmem:[%s2199_s0 + $0x6] sm:$0x3f] }
   0x8   :  { %v347_v24 = vrot.slane %v344_v17, 3  ;;  %1522 = vrot.lane.b32.xlu0 %v1521_v21, %s1603_s23  ;;  %v87_v28 = vunpack.c.h.bf16 %v84_v16  ;;  %v141_v29 = vunpack.c.l.bf16 %v139_v20  ;;  %v17_v33 = vld [vmem:[%s2199_s0] sm:$0x3f]  ;;  %v142_v35 = vunpack.c.h.bf16 %v139_v20  ;;  %v232_v11 = vld [vmem:[%s2199_s0 + $0x6] sm:$0x3f] }
   0x9   :  { %v299_v25 = vrot.slane %v296_v19, 6  ;;  %v1526_v27 = vpack.i.bf16 %v245_v15, %v244_v22  ;;  %v94_v31 = vcombine.high %v86_v26, %v86_v26  ;;  %v298_v37 = vrot.slane %v288_v10, 6  ;;  %v36_v43 = vld [vmem:[%s2199_s0] sm:$0x3f]  ;;  %v335_v14 = vld [vmem:[%s2199_s0 + $0x6] sm:$0x3f] }
   0xa   :  { %v1536_v30 = vpack.i.bf16 %v348_v18, %v347_v24  ;;  %v149_v36 = vcombine.high %v141_v29, %v141_v29  ;;  %v98_v40 = vrot.slane %v87_v28, 2  ;;  %v190_v41 = vunpack.c.h.bf16 %v187_v32  ;;  %v427_v10 = vld [vmem:[%s2200_s2] sm:$0xff]  ;;  %v428_v16 = vld [vmem:[%s2200_s2 + $0x8] sm:$0xff] }
   0xb   :  { %1527 = vrot.lane.b32.xlu1 %v1526_v27, %s1604_s28  ;;  %v1531_v34 = vpack.i.bf16 %v300_v23, %v299_v25  ;;  %v97_v39 = vrot.slane %v94_v31, 2  ;;  %v19_v42 = vunpack.c.l.bf16 %v17_v33  ;;  %v20_v44 = vunpack.c.h.bf16 %v17_v33  ;;  %v287_v15 = vld [vmem:[%s2199_s0 + $0x6] sm:$0x3f] }
   0xc   :  { %1537 = vrot.lane.b32.xlu0 %v1536_v30, %s1605_s9  ;;  %v346_v45 = vrot.slane %v1650_v8, 3  ;;  %v152_v46 = vrot.slane %v149_v36, 7  ;;  %v153_v47 = vrot.slane %v142_v35, 7  ;;  %v189_v49 = vunpack.c.l.bf16 %v187_v32  ;;  %v85_v23 = vld [vmem:[%s2199_s0 + $0x6] sm:$0x3f] }
   0xd   :  { %29 = vst [vmem:[#allocation2] sm:$0x7] %v19_v42  ;;  %v25_v51 = vcombine.high %v19_v42, %v19_v42  ;;  %32 = vst.msk [vmem:[#allocation2 + $0x10] sm:$0x7] %vm31_vm0, %v20_v44  ;;  %v1541_v52 = vpack.i.bf16 %v98_v40, %v97_v39  ;;  %v198_v53 = vcombine.low %v190_v41, %v190_v41  ;;  %v38_v54 = vunpack.c.l.bf16 %v36_v43  ;;  %v140_v31 = vld [vmem:[%s2199_s0 + $0x6] sm:$0x3f] }
   0xe   :  { %v1546_v56 = vpack.i.bf16 %v153_v47, %v152_v46  ;;  %v39_v58 = vunpack.c.h.bf16 %v36_v43  ;;  %v96_v60 = vrot.slane %v86_v26, 2  ;;  %v151_v61 = vrot.slane %v141_v29, 7  ;;  %v188_v40 = vld [vmem:[%s2199_s0 + $0x6] sm:$0x3f] }
   0xf   :  { %1532 = vrot.lane.b32.xlu1 %v1531_v34, %s1606_s12  ;;  %30 = vst [vmem:[#allocation2 + $0x8] sm:$0x7] %v25_v51  ;;  %v1551_v57 = vpack.i.bf16 %v198_v53, %v189_v49  ;;  %v46_v59 = vcombine.high %v38_v54, %v38_v54  ;;  %v197_v0 = vcombine.low %v189_v49, %v189_v49  ;;  %v48_v2 = vrot.slane %v38_v54, 5  ;;  %v37_v54 = vld [vmem:[%s2199_s0 + $0x6] sm:$0x3f] }
  0x10   :  { %304 = vrot.lane.b32.xlu0 %v298_v37, %s1606_s12  ;;  %v50_v63 = vrot.slane %v39_v58, 5  ;;  %v1610_v3 = vmov 0.0   ;;  %v386_v5 = vunpack.c.l.bf16 %v383_v4  ;;  %v387_v6 = vunpack.c.h.bf16 %v383_v4  ;;  %v1770_v4 = vld [vmem:[%s2201_s3 + $0x68] sm:$0xff] }
  0x11   :  { %v49_v62 = vrot.slane %v46_v59, 5  ;;  %586 = vmatprep.mubr.f32.mxu1 %v1610_v3  ;;  %v1612_v8 = vmov 0   ;;  %v235_v12 = vunpack.c.l.bf16 %v232_v11  ;;  %v236_v13 = vunpack.c.h.bf16 %v232_v11  ;;  %v1789_v11 = vld [vmem:[%s2201_s3 + $0xd8] sm:$0xff] }
  0x12   :  { %v393_v7 = vcombine.high %v386_v5, %v386_v5  ;;  %1561 = vset.pattern.permute.xlu0 %v1612_v8  ;;  %1567 = vset.pattern.permute.xlu1 %v1612_v8  ;;  %v338_v17 = vunpack.c.l.bf16 %v335_v14  ;;  %v339_v18 = vunpack.c.h.bf16 %v335_v14  ;;  %v290_v19 = vunpack.c.l.bf16 %v287_v15  ;;  %v1776_v8 = vld [vmem:[%s2201_s3 + $0xe0] sm:$0xff]  ;;  %v1802_v14 = vld [vmem:[%s2201_s3 + $0xd0] sm:$0xff] }
  0x13   :  { %352 = vrot.lane.b32.xlu1 %v346_v45, %s1605_s9  ;;  %v1556_v1 = vpack.i.bf16 %v50_v63, %v49_v62  ;;  %v291_v20 = vunpack.c.h.bf16 %v287_v15  ;;  %v242_v21 = vcombine.high %v235_v12, %v235_v12  ;;  %v248_v22 = vrot.slane %v236_v13, 1  ;;  %v430_v62 = vld [vmem:[%s2200_s2 + $0x18] sm:$0xff] }
  0x14   :  { %1542 = vrot.lane.b32.xlu0 %v1541_v52, %s1607_s13  ;;  %v1562_v9 = vpack.i.bf16 %v387_v6, %v393_v7  ;;  %v345_v24 = vcombine.high %v338_v17, %v338_v17  ;;  %v297_v25 = vcombine.high %v290_v19, %v290_v19  ;;  %v351_v27 = vrot.slane %v339_v18, 3  ;;  %v1821_v18 = vld [vmem:[%s2201_s3 + $0x48] sm:$0xff] }
  0x15   :  { %v247_v26 = vrot.slane %v242_v21, 1  ;;  %v303_v28 = vrot.slane %v291_v20, 6  ;;  %v88_v32 = vunpack.c.l.bf16 %v85_v23  ;;  %v143_v36 = vunpack.c.l.bf16 %v140_v31  ;;  %v1835_v20 = vld [vmem:[%s2201_s3 + $0x40] sm:$0xff]  ;;  %v1841_v21 = vld [vmem:[%s2201_s3 + $0xb8] sm:$0xff] }
  0x16   :  { %v350_v29 = vrot.slane %v345_v24, 3  ;;  %v302_v30 = vrot.slane %v297_v25, 6  ;;  %v246_v37 = vrot.slane %v235_v12, 1  ;;  %v89_v38 = vunpack.c.h.bf16 %v85_v23  ;;  %v1795_v12 = vld [vmem:[%s2201_s3 + $0x58] sm:$0xff]  ;;  %v1853_v23 = vld [vmem:[%s2201_s3 + $0xb0] sm:$0xff]  ;;  %v1865_v25 = vld [vmem:[%s2201_s3 + $0xa8] sm:$0xff] }
  0x17   :  { %1547 = vrot.lane.b32.xlu1 %v1546_v56, %s1608_s14  ;;  %v1568_v33 = vpack.i.bf16 %v248_v22, %v247_v26  ;;  %v95_v39 = vcombine.high %v88_v32, %v88_v32  ;;  %v301_v41 = vrot.slane %v290_v19, 6  ;;  %v144_v42 = vunpack.c.h.bf16 %v140_v31  ;;  %v1828_v19 = vld [vmem:[%s2201_s3 + $0xc0] sm:$0xff]  ;;  %v1847_v22 = vld [vmem:[%s2201_s3 + $0x38] sm:$0xff]  ;;  %v1859_v24 = vld [vmem:[%s2201_s3 + $0x30] sm:$0xff] }
  0x18   :  { %1552 = vrot.lane.b32.xlu0 %v1551_v57, %s1609_s15  ;;  %v1573_v34 = vpack.i.bf16 %v303_v28, %v302_v30  ;;  %v1578_v35 = vpack.i.bf16 %v351_v27, %v350_v29  ;;  %v150_v43 = vcombine.high %v143_v36, %v143_v36  ;;  %v349_v44 = vrot.slane %v338_v17, 3  ;;  %v1815_v17 = vld [vmem:[%s2201_s3 + $0xc8] sm:$0xff]  ;;  %v1877_v27 = vld [vmem:[%s2201_s3 + $0xa0] sm:$0xff] }
  0x19   :  { %v100_v45 = vrot.slane %v95_v39, 2  ;;  %v101_v46 = vrot.slane %v89_v38, 2  ;;  %v192_v47 = vunpack.c.h.bf16 %v188_v40  ;;  %v156_v49 = vrot.slane %v144_v42, 7  ;;  %v1871_v26 = vld [vmem:[%s2201_s3 + $0x28] sm:$0xff]  ;;  %v1883_v28 = vld [vmem:[%s2201_s3 + $0x20] sm:$0xff] }
  0x1a   :  { %v155_v48 = vrot.slane %v150_v43, 7  ;;  %v191_v52 = vunpack.c.l.bf16 %v188_v40  ;;  %v40_v56 = vunpack.c.l.bf16 %v37_v54  ;;  %v41_v58 = vunpack.c.h.bf16 %v37_v54 }
  0x1b   :  { %102 = vrot.lane.b32.xlu1 %v96_v60, %s1607_s13  ;;  %v1583_v51 = vpack.i.bf16 %v101_v46, %v100_v45  ;;  %v200_v53 = vcombine.low %v192_v47, %v192_v47  ;;  %v1738_v60 = vld [vmem:[%s2201_s3 + $0xf8] sm:$0xff]  ;;  %v99_v63 = vrot.slane %v88_v32, 2  ;;  %vm2204_vm6 = vcmask 744448  }
  0x1c   :  { %157 = vrot.lane.b32.xlu0 %v151_v61, %s1608_s14  ;;  %v1588_v55 = vpack.i.bf16 %v156_v49, %v155_v48  ;;  %v47_v59 = vcombine.high %v40_v56, %v40_v56  ;;  %v1743_v61 = vld [vmem:[%s2201_s3 + $0x78] sm:$0xff]  ;;  %1343 = vmatprep.subr.mxu0 %v1738_v60  ;;  %v53_v7 = vrot.slane %v41_v58, 5  ;;  %v51_v15 = vrot.slane %v40_v56, 5 }
  0x1d   :  { %v1593_v57 = vpack.i.bf16 %v200_v53, %v191_v52  ;;  %1344 = vmatpush3.msra.mxu0 %v1743_v61  ;;  %vm329_vm7 = vcmask 241666   ;;  %vm316_vm8 = vcmask 752640   ;;  %vm512_vm9 = vcmask 1042432  }
  0x1e   :  { %v52_v6 = vrot.slane %v47_v59, 5  ;;  %vm127_vm10 = vcmask 244742   ;;  %vm2206_vm11 = vcmask 237568   ;;  %vm114_vm12 = vcmask 1031168  }
  0x1f   :  { %201 = vrot.lane.b32.xlu1 %v197_v0, %s1609_s15  ;;  %v1753_v0 = vld [vmem:[%s2201_s3 + $0xf0] sm:$0xff]  ;;  %vm2205_vm13 = vcmask 240641   ;;  %vm2207_vm14 = vcmask 900096   ;;  %vm226_vm15 = vcmask 243716  }
  0x20   :  { %1557 = vrot.lane.b32.xlu0 %v1556_v1, %s1611_s16  ;;  %v1758_v1 = vld [vmem:[%s2201_s3 + $0x70] sm:$0xff]  ;;  %1345 = vmatprep.subr.mxu0 %v1753_v0  ;;  %v1598_v13 = vpack.i.bf16 %v53_v7, %v52_v6 }
  0x21   :  { %1346 = vmatpush3.msra.mxu0 %v1758_v1 }
  0x23   :  { %54 = vrot.lane.b32.xlu1 %v48_v2, %s1611_s16  ;;  %v1764_v2 = vld [vmem:[%s2201_s3 + $0xe8] sm:$0xff] }
  0x24   :  { %481 = vperm.xlu0 %1561, %v427_v10   ;;  %1347 = vmatprep.subr.mxu0 %v1764_v2  ;;  %v1783_v10 = vld [vmem:[%s2201_s3 + $0x60] sm:$0xff] }
  0x25   :  { %1348 = vmatpush3.msra.mxu0 %v1770_v4 }
  0x26   :  { %1349 = vmatprep.subr.mxu0 %v1776_v8 }
  0x27   :  { %1563 = vrot.lane.b32.xlu1 %v1562_v9, %s1603_s23  ;;  %v199_v9 = vcombine.low %v191_v52, %v191_v52  ;;  %1350 = vmatpush3.msra.mxu0 %v1783_v10 }
  0x28   :  { %400 = vrot.lane.b32.xlu0 %v386_v5, %s1603_s23  ;;  %v154_v5 = vrot.slane %v143_v36, 7  ;;  %1351 = vmatprep.subr.mxu0 %v1789_v11 }
  0x29   :  { %1352 = vmatpush3.msra.mxu0 %v1795_v12 }
  0x2a   :  { %1353 = vmatprep.subr.mxu0 %v1802_v14 }
  0x2b   :  { %486 = vperm.xlu1 %1567, %v428_v16   ;;  %v1809_v16 = vld [vmem:[%s2201_s3 + $0x50] sm:$0xff] }
  0x2c   :  { %1574 = vrot.lane.b32.xlu0 %v1573_v34, %s1606_s12  ;;  %1354 = vmatpush3.msra.mxu0 %v1809_v16 }
  0x2d   :  { %1355 = vmatprep.subr.mxu0 %v1815_v17 }
  0x2e   :  { %1356 = vmatpush3.msra.mxu0 %v1821_v18 }
  0x2f   :  { %1569 = vrot.lane.b32.xlu1 %v1568_v33, %s1604_s28  ;;  %1357 = vmatprep.subr.mxu0 %v1828_v19 }
  0x30   :  { %255 = vrot.lane.b32.xlu0 %v246_v37, %s1604_s28  ;;  %1358 = vmatpush3.msra.mxu0 %v1835_v20 }
  0x31   :  { %1359 = vmatprep.subr.mxu0 %v1841_v21 }
  0x32   :  { %1360 = vmatpush3.msra.mxu0 %v1847_v22 }
  0x33   :  { %1579 = vrot.lane.b32.xlu1 %v1578_v35, %s1605_s9  ;;  %1361 = vmatprep.subr.mxu0 %v1853_v23 }
  0x34   :  { %358 = vrot.lane.b32.xlu0 %v349_v44, %s1605_s9  ;;  %1362 = vmatpush3.msra.mxu0 %v1859_v24 }
  0x35   :  { %1363 = vmatprep.subr.mxu0 %v1865_v25 }
  0x36   :  { %1364 = vmatpush3.msra.mxu0 %v1871_v26 }
  0x37   :  { %310 = vrot.lane.b32.xlu1 %v301_v41, %s1606_s12  ;;  %1365 = vmatprep.subr.mxu0 %v1877_v27 }
  0x38   :  { %1584 = vrot.lane.b32.xlu0 %v1583_v51, %s1607_s13  ;;  %1366 = vmatpush3.msra.mxu0 %v1883_v28 }
  0x3b   :  { %491 = vperm.xlu1 %1567, %v429_v50  }
  0x3c   :  { %1594 = vrot.lane.b32.xlu0 %v1593_v57, %s1609_s15 }
  0x3f   :  { %1589 = vrot.lane.b32.xlu1 %v1588_v55, %s1608_s14 }
  0x40   :  { %108 = vrot.lane.b32.xlu0 %v99_v63, %s1607_s13 }
  0x43   :  { %496 = vperm.xlu1 %1567, %v430_v62  }
  0x44   :  { %207 = vrot.lane.b32.xlu0 %v199_v9, %s1609_s15 }
  0x47   :  { %163 = vrot.lane.b32.xlu1 %v154_v5, %s1608_s14 }
  0x48   :  { %60 = vrot.lane.b32.xlu0 %v51_v15, %s1611_s16 }
  0x4b   :  { %1599 = vrot.lane.b32.xlu1 %v1598_v13, %s1611_s16 }
  0x76   :  { %v395_v29 = vpop.permute.xlu0 %394 }
  0x79   :  { %v250_v30 = vpop.permute.xlu1 %249 }
  0x7a   :  { %v1523_v31 = vpop.permute.xlu0 %1522 }
  0x7b   :  { %v1525_v32 = vunpack.i.h.bf16 %v1523_v31  ;;  %v1524_v33 = vunpack.i.l.bf16 %v1523_v31 }
  0x7d   :  { %v1528_v34 = vpop.permute.xlu1 %1527  ;;  %419 = vst.msk [vmem:[#allocation2 + $0x58] sm:$0x7] %vm31_vm0, %v1525_v32  ;;  %v407_v35 = vsel %vm406_vm1, %v395_v29, %v1524_v33  ;;  %v408_v36 = vsel %vm406_vm1, %v1524_v33, %v1525_v32 }
  0x7e   :  { %v1530_v37 = vunpack.i.h.bf16 %v1528_v34  ;;  %v1529_v38 = vunpack.i.l.bf16 %v1528_v34  ;;  %417 = vst [vmem:[#allocation2 + $0x48] sm:$0x7] %v407_v35  ;;  %418 = vst [vmem:[#allocation2 + $0x50] sm:$0x7] %v408_v36  ;;  %v1538_v39 = vpop.permute.xlu0 %1537 }
  0x7f   :  { %v1540_v42 = vunpack.i.h.bf16 %v1538_v39  ;;  %v1539_v43 = vunpack.i.l.bf16 %v1538_v39 }
  0x80   :  { %275 = vst.msk [vmem:[#allocation2 + $0x28] sm:$0x80] %vm274_vm3, %v1530_v37  ;;  %v262_v40 = vsel %vm261_vm2, %v250_v30, %v1529_v38  ;;  %v263_v41 = vsel %vm261_vm2, %v1529_v38, %v1530_v37 }
  0x81   :  { %279 = vst.msk [vmem:[#allocation2 + $0x40] sm:$0x3] %vm278_vm4, %v1530_v37  ;;  %272 = vst [vmem:[#allocation2 + $0x30] ss:$-20 sps:$4 sm:$0x83] %v262_v40   ;;  %v1533_v44 = vpop.permute.xlu1 %1532  ;;  %v366_v47 = vsel %vm2204_vm6, %v1539_v43, %v1540_v42 }
  0x82   :  { %273 = vst [vmem:[#allocation2 + $0x38] ss:$-20 sps:$4 sm:$0x83] %v263_v41   ;;  %378 = vst.msk [vmem:[#allocation2 + $0x40] sm:$0xe0] %vm377_vm5, %v1540_v42  ;;  %v1535_v45 = vunpack.i.h.bf16 %v1533_v44  ;;  %v1534_v46 = vunpack.i.l.bf16 %v1533_v44  ;;  %v305_v48 = vpop.permute.xlu0 %304 }
  0x83   :  { %376 = vst [vmem:[#allocation2 + $0x38] sm:$0xe0] %v366_v47 }
  0x84   :  { %330 = vst.msk [vmem:[#allocation2 + $0x40] sm:$0x1c] %vm329_vm7, %v1535_v45  ;;  %v317_v49 = vsel %vm316_vm8, %v305_v48, %v1534_v46  ;;  %v318_v50 = vsel %vm316_vm8, %v1534_v46, %v1535_v45  ;;  %v1919_v46 = vld [vmem:[%s2202_s1] sm:$0xff]  ;;  %v478_v47 = vld [vmem:[#allocation2 + $0x58] sm:$0x7] }
  0x85   :  { %327 = vst [vmem:[#allocation2 + $0x30] sm:$0x1c] %v317_v49  ;;  %328 = vst [vmem:[#allocation2 + $0x38] sm:$0x1c] %v318_v50  ;;  %v353_v51 = vpop.permute.xlu1 %352  ;;  %v477_v53 = vld [vmem:[#allocation2 + $0x50] sm:$0x7] }
  0x86   :  { %v365_v52 = vsel %vm2204_vm6, %v353_v51, %v1539_v43  ;;  %v476_v54 = vld [vmem:[#allocation2 + $0x48] sm:$0x7]  ;;  %1299 = vmatprep.subr.msk.mxu1 %vm512_vm9, %v477_v53  ;;  %v1543_v55 = vpop.permute.xlu0 %1542  ;;  %vm213_vm6 = vcmask 891904   ;;  %v1942_v53 = vld [vmem:[%s2201_s3 + $0x118] sm:$0x3f] }
  0x87   :  { %375 = vst [vmem:[#allocation2 + $0x30] sm:$0xe0] %v365_v52  ;;  %v1545_v56 = vunpack.i.h.bf16 %v1543_v55  ;;  %v1544_v57 = vunpack.i.l.bf16 %v1543_v55  ;;  %1300 = vmatpush1.msk.msra.mxu1 %vm512_vm9, %v476_v54  ;;  %v1929_v49 = vld [vmem:[%s2202_s1 + $0x8] sm:$0xff]  ;;  %v1937_v52 = vld [vmem:[%s2202_s1 + $0x10] sm:$0xff] }
  0x89   :  { %v1548_v58 = vpop.permute.xlu1 %1547  ;;  %128 = vst.msk [vmem:[#allocation2 + $0x10] sm:$0xc0] %vm127_vm10, %v1545_v56  ;;  %v116_v63 = vsel %vm114_vm12, %v1544_v57, %v1545_v56 }
  0x8a   :  { %132 = vst.msk [vmem:[#allocation2 + $0x28] sm:$0x1] %vm2206_vm11, %v1545_v56  ;;  %v1550_v59 = vunpack.i.h.bf16 %v1548_v58  ;;  %v1549_v62 = vunpack.i.l.bf16 %v1548_v58  ;;  %v1553_v5 = vpop.permute.xlu0 %1552  ;;  %126 = vst [vmem:[#allocation2 + $0x20] ss:$-20 sps:$4 sm:$0xc1] %v116_v63   ;;  %vm2208_vm11 = vcmask 1039360  }
  0x8b   :  { %v1555_v6 = vunpack.i.h.bf16 %v1553_v5  ;;  %v1554_v7 = vunpack.i.l.bf16 %v1553_v5  ;;  %v475_v48 = vld [vmem:[#allocation2 + $0x40] sm:$0xff]  ;;  %v1976_v63 = vld [vmem:[%s2201_s3 + $0x108] sm:$0xff] }
  0x8c   :  { %183 = vst.msk [vmem:[#allocation2 + $0x28] sm:$0xe] %vm2205_vm13, %v1550_v59  ;;  %v474_v9 = vld [vmem:[#allocation2 + $0x38] sm:$0xff]  ;;  %v171_v13 = vsel %vm2207_vm14, %v1549_v62, %v1550_v59  ;;  %vm79_vm13 = vcmask 242691  }
  0x8d   :  { %548 = vmatprep.subr.mxu1 %v474_v9  ;;  %v103_v15 = vpop.permute.xlu1 %102  ;;  %181 = vst [vmem:[#allocation2 + $0x20] sm:$0xe] %v171_v13  ;;  %227 = vst.msk [vmem:[#allocation2 + $0x28] sm:$0x70] %vm226_vm15, %v1555_v6  ;;  %v215_v31 = vsel %vm213_vm6, %v1554_v7, %v1555_v6  ;;  %v1986_v9 = vld [vmem:[%s2201_s3 + $0x100] sm:$0xff] }
  0x8e   :  { %v115_v29 = vsel %vm114_vm12, %v103_v15, %v1544_v57  ;;  %v473_v30 = vld [vmem:[#allocation2 + $0x30] sm:$0xff]  ;;  %v158_v32 = vpop.permute.xlu0 %157  ;;  %225 = vst [vmem:[#allocation2 + $0x20] sm:$0x70] %v215_v31  ;;  %v1952_v57 = vld [vmem:[%s2202_s1 + $0x18] sm:$0xff] }
  0x8f   :  { %125 = vst [vmem:[#allocation2 + $0x18] ss:$-20 sps:$4 sm:$0xc1] %v115_v29   ;;  %549 = vmatpush1.msra.mxu1 %v473_v30  ;;  %v170_v33 = vsel %vm2207_vm14, %v158_v32, %v1549_v62  ;;  %vm499_vm14 = vcmask 220160   ;;  %v1965_v62 = vld [vmem:[%s2201_s3 + $0x110] sm:$0xff] }
  0x90   :  { %180 = vst [vmem:[#allocation2 + $0x18] sm:$0xe] %v170_v33 }
  0x91   :  { %v202_v34 = vpop.permute.xlu1 %201 }
  0x92   :  { %v214_v35 = vsel %vm213_vm6, %v202_v34, %v1554_v7  ;;  %v1558_v36 = vpop.permute.xlu0 %1557 }
  0x93   :  { %224 = vst [vmem:[#allocation2 + $0x18] sm:$0x70] %v214_v35  ;;  %v1560_v37 = vunpack.i.h.bf16 %v1558_v36  ;;  %v1559_v38 = vunpack.i.l.bf16 %v1558_v36 }
  0x94   :  { %v472_v50 = vld [vmem:[#allocation2 + $0x28] sm:$0xff] }
  0x95   :  { %v55_v39 = vpop.permute.xlu1 %54  ;;  %80 = vst.msk [vmem:[#allocation2 + $0x10] sm:$0x38] %vm79_vm13, %v1560_v37  ;;  %v68_v41 = vsel %vm2208_vm11, %v1559_v38, %v1560_v37  ;;  %v471_v42 = vld [vmem:[#allocation2 + $0x20] sm:$0xff] }
  0x96   :  { %v67_v40 = vsel %vm2208_vm11, %v55_v39, %v1559_v38  ;;  %78 = vst [vmem:[#allocation2 + $0x8] sm:$0x38] %v68_v41  ;;  %550 = vmatprep.subr.mxu1 %v471_v42  ;;  %vm721_vm11 = vcmask 1045504  }
  0x97   :  { %77 = vst [vmem:[#allocation2] sm:$0x38] %v67_v40 }
  0x99   :  { %v1564_v54 = vpop.permute.xlu1 %1563 }
  0x9a   :  { %v470_v43 = vld [vmem:[#allocation2 + $0x18] sm:$0xff]  ;;  %v1566_v55 = vunpack.i.h.bf16 %v1564_v54  ;;  %v1565_v56 = vunpack.i.l.bf16 %v1564_v54 }
  0x9b   :  { %551 = vmatpush1.msra.mxu1 %v470_v43 }
  0x9c   :  { %v469_v51 = vld [vmem:[#allocation2 + $0x10] sm:$0xff]  ;;  %422 = vst.msk [vmem:[#allocation2 + $0xb8] sm:$0x7] %vm31_vm0, %v1566_v55  ;;  %v410_v58 = vsel %vm406_vm1, %v1565_v56, %v1566_v55  ;;  %vm2209_vm0 = vcmask 744448  }
  0x9d   :  { %v468_v44 = vld [vmem:[#allocation2 + $0x8] sm:$0xff]  ;;  %421 = vst [vmem:[#allocation2 + $0xb0] sm:$0x7] %v410_v58 }
  0x9e   :  { %v467_v45 = vld [vmem:[#allocation2] sm:$0xff]  ;;  %552 = vmatprep.subr.mxu1 %v468_v44 }
  0x9f   :  { %553 = vmatpush1.msra.mxu1 %v467_v45  ;;  %v1960_v59 = vpop.permute.xlu0 %481 }
  0xa0   :  { %1301 = vmatmul.mubr.msk.f32.vlgmr.msra.gmra.mxu1 %vm499_vm14, %v1919_v46  ;;  %1455 = vmatprep.subr.msk.mxu1 %vm512_vm9, %v478_v47 }
  0xa1   :  { %1456 = vmatpush3.msk.msra.mxu1 %vm512_vm9, %v478_v47  ;;  %592 = vmatprep.mubr.f32.mxu1 %v1610_v3 }
  0xa2   :  { %1457 = vmatprep.subr.mxu1 %v475_v48 }
  0xa3   :  { %1458 = vmatpush3.msra.mxu1 %v475_v48  ;;  %v401_v5 = vpop.permute.xlu0 %400 }
  0xa4   :  { %1302 = vmatmul.mubr.msk.f32.gmra.mxu1 %vm499_vm14, %v1929_v49  ;;  %1459 = vmatprep.subr.mxu1 %v472_v50  ;;  %v409_v7 = vsel %vm406_vm1, %v401_v5, %v1565_v56  ;;  %v911_v13 = vld [vmem:[#allocation2 + $0xb0] sm:$0x7]  ;;  %vm2210_vm1 = vmmov %vm2209_vm0 }
  0xa5   :  { %1460 = vmatpush3.msra.mxu1 %v472_v50  ;;  %598 = vmatprep.mubr.f32.mxu1 %v1610_v3  ;;  %420 = vst [vmem:[#allocation2 + $0xa8] sm:$0x7] %v409_v7 }
  0xa6   :  { %1461 = vmatprep.subr.mxu1 %v469_v51  ;;  %v1979_v6 = vpop.permute.xlu1 %486 }
  0xa7   :  { %1462 = vmatpush3.msra.mxu1 %v469_v51  ;;  %v1575_v15 = vpop.permute.xlu0 %1574 }
  0xa8   :  { %1303 = vmatmul.mubr.msk.f32.gmra.mxu1 %vm499_vm14, %v1937_v52  ;;  %1469 = vmatprep.subr.msk.mxu1 %vm721_vm11, %v1942_v53  ;;  %v1577_v30 = vunpack.i.h.bf16 %v1575_v15  ;;  %v1576_v31 = vunpack.i.l.bf16 %v1575_v15 }
  0xa9   :  { %604 = vmatprep.mubr.f32.mxu1 %v1610_v3 }
  0xaa   :  { %v1570_v29 = vpop.permute.xlu1 %1569  ;;  %333 = vst.msk [vmem:[#allocation2 + $0xa0] sm:$0x1c] %vm329_vm7, %v1577_v30  ;;  %v320_v34 = vsel %vm316_vm8, %v1576_v31, %v1577_v30 }
  0xab   :  { %v1572_v32 = vunpack.i.h.bf16 %v1570_v29  ;;  %v1571_v33 = vunpack.i.l.bf16 %v1570_v29  ;;  %332 = vst [vmem:[#allocation2 + $0x98] sm:$0x1c] %v320_v34  ;;  %v256_v36 = vpop.permute.xlu0 %255 }
  0xac   :  { %1304 = vmatmul.mubr.msk.f32.gmra.mxu1 %vm499_vm14, %v1952_v57 }
  0xad   :  { %1463 = vmatprep.mubr.msk.f32.mxu1 %vm499_vm14, %v1919_v46  ;;  %282 = vst.msk [vmem:[#allocation2 + $0x88] sm:$0x80] %vm274_vm3, %v1572_v32  ;;  %v265_v35 = vsel %vm261_vm2, %v1571_v33, %v1572_v32  ;;  %v264_v38 = vsel %vm261_vm2, %v256_v36, %v1571_v33  ;;  %vm2211_vm2 = vcmask 237568   ;;  %vm2212_vm3 = vcmask 240641  }
  0xae   :  { %285 = vst.msk [vmem:[#allocation2 + $0xa0] sm:$0x3] %vm278_vm4, %v1572_v32  ;;  %281 = vst [vmem:[#allocation2 + $0x98] ss:$-20 sps:$4 sm:$0x83] %v265_v35   ;;  %v1580_v37 = vpop.permute.xlu1 %1579  ;;  %vm2213_vm4 = vcmask 900096  }
  0xaf   :  { %v1582_v39 = vunpack.i.h.bf16 %v1580_v37  ;;  %v1581_v40 = vunpack.i.l.bf16 %v1580_v37  ;;  %280 = vst [vmem:[#allocation2 + $0x90] ss:$-20 sps:$4 sm:$0x83] %v264_v38   ;;  %v359_v42 = vpop.permute.xlu0 %358  ;;  %v2022_v37 = vld [vmem:[%s2201_s3 + $0x98] sm:$0xff] }
  0xb0   :  { %1464 = vmatmul.mubr.msk.f32.vlgmr.msra.gmra.mxu1 %vm499_vm14, %v1929_v49  ;;  %1367 = vmatprep.subr.mxu0 %v2022_v37  ;;  %v2028_v38 = vld [vmem:[%s2201_s3 + $0x18] sm:$0xff] }
  0xb1   :  { %1466 = vmatprep.mubr.msk.f32.mxu1 %vm499_vm14, %v1937_v52  ;;  %1470 = vmatpush3.msk.msra.mxu1 %vm721_vm11, %v1942_v53  ;;  %381 = vst.msk [vmem:[#allocation2 + $0xa0] sm:$0xe0] %vm377_vm5, %v1582_v39  ;;  %v368_v41 = vsel %vm2209_vm0, %v1581_v40, %v1582_v39  ;;  %v367_v44 = vsel %vm2210_vm1, %v359_v42, %v1581_v40  ;;  %vm2214_vm5 = vmmov %vm2213_vm4  ;;  %v2034_v39 = vld [vmem:[%s2201_s3 + $0x90] sm:$0xff]  ;;  %v2052_v42 = vld [vmem:[%s2201_s3 + $0x8] sm:$0xff] }
  0xb2   :  { %1471 = vmatprep.subr.mxu1 %v1965_v62  ;;  %380 = vst [vmem:[#allocation2 + $0x98] sm:$0xe0] %v368_v41  ;;  %v311_v43 = vpop.permute.xlu1 %310  ;;  %379 = vst [vmem:[#allocation2 + $0x90] sm:$0xe0] %v367_v44  ;;  %1368 = vmatpush3.msra.mxu0 %v2028_v38  ;;  %v2040_v40 = vld [vmem:[%s2201_s3 + $0x10] sm:$0xff]  ;;  %v2046_v41 = vld [vmem:[%s2201_s3 + $0x88] sm:$0xff] }
  0xb3   :  { %1472 = vmatpush3.msra.mxu1 %v1965_v62  ;;  %v319_v45 = vsel %vm316_vm8, %v311_v43, %v1576_v31  ;;  %v1585_v47 = vpop.permute.xlu0 %1584  ;;  %1369 = vmatprep.subr.mxu0 %v2034_v39  ;;  %v2058_v44 = vld [vmem:[%s2201_s3 + $0x80] sm:$0xff]  ;;  %vm708_vm8 = vcmask 244736  }
  0xb4   :  { %1467 = vmatmul.mubr.msk.f32.gmra.mxu1 %vm499_vm14, %v1952_v57  ;;  %1473 = vmatprep.subr.mxu1 %v1976_v63  ;;  %331 = vst [vmem:[#allocation2 + $0x90] sm:$0x1c] %v319_v45  ;;  %v1587_v50 = vunpack.i.h.bf16 %v1585_v47  ;;  %v1586_v51 = vunpack.i.l.bf16 %v1585_v47 }
  0xb5   :  { %1474 = vmatpush3.msra.mxu1 %v1976_v63  ;;  %1370 = vmatpush3.msra.mxu0 %v2040_v40 }
  0xb6   :  { %1475 = vmatprep.subr.mxu1 %v1986_v9  ;;  %v2005_v48 = vpop.permute.xlu1 %491  ;;  %135 = vst.msk [vmem:[#allocation2 + $0x70] sm:$0xc0] %vm127_vm10, %v1587_v50  ;;  %v118_v54 = vsel %vm114_vm12, %v1586_v51, %v1587_v50  ;;  %1371 = vmatprep.subr.mxu0 %v2046_v41 }
  0xb7   :  { %1476 = vmatpush3.msra.mxu1 %v1986_v9  ;;  %138 = vst.msk [vmem:[#allocation2 + $0x88] sm:$0x1] %vm2211_vm2, %v1587_v50  ;;  %134 = vst [vmem:[#allocation2 + $0x80] ss:$-20 sps:$4 sm:$0xc1] %v118_v54   ;;  %v1595_v55 = vpop.permute.xlu0 %1594  ;;  %1372 = vmatpush3.msra.mxu0 %v2052_v42  ;;  %v2064_v50 = vld [vmem:[%s2201_s3] sm:$0xff] }
  0xb8   :  { %1315 = vmatprep.subr.msk.mxu1 %vm512_vm9, %v911_v13  ;;  %v1597_v58 = vunpack.i.h.bf16 %v1595_v55  ;;  %v1596_v5 = vunpack.i.l.bf16 %v1595_v55  ;;  %1373 = vmatprep.subr.mxu0 %v2058_v44 }
  0xb9   :  { %1374 = vmatpush3.msra.mxu0 %v2064_v50 }
  0xba   :  { %v1590_v56 = vpop.permute.xlu1 %1589  ;;  %230 = vst.msk [vmem:[#allocation2 + $0x88] sm:$0x70] %vm226_vm15, %v1597_v58  ;;  %v217_v15 = vsel %vm213_vm6, %v1596_v5, %v1597_v58  ;;  %1403 = vmatprep.subr.mxu0 %v1738_v60 }
  0xbb   :  { %v1592_v7 = vunpack.i.h.bf16 %v1590_v56  ;;  %v1591_v13 = vunpack.i.l.bf16 %v1590_v56  ;;  %229 = vst [vmem:[#allocation2 + $0x80] sm:$0x70] %v217_v15  ;;  %v109_v30 = vpop.permute.xlu0 %108 }
  0xbc   :  { %v117_v32 = vsel %vm114_vm12, %v109_v30, %v1586_v51 }
  0xbd   :  { %186 = vst.msk [vmem:[#allocation2 + $0x88] sm:$0xe] %vm2212_vm3, %v1592_v7  ;;  %v173_v29 = vsel %vm2213_vm4, %v1591_v13, %v1592_v7  ;;  %133 = vst [vmem:[#allocation2 + $0x78] ss:$-20 sps:$4 sm:$0xc1] %v117_v32  }
  0xbe   :  { %185 = vst [vmem:[#allocation2 + $0x80] sm:$0xe] %v173_v29  ;;  %v2014_v31 = vpop.permute.xlu1 %496 }
  0xbf   :  { %v208_v33 = vpop.permute.xlu0 %207 }
  0xc0   :  { %v216_v35 = vsel %vm213_vm6, %v208_v33, %v1596_v5  ;;  %vm2215_vm6 = vcmask 1039360  }
  0xc1   :  { %228 = vst [vmem:[#allocation2 + $0x78] sm:$0x70] %v216_v35  ;;  %vm2216_vm7 = vmmov %vm2215_vm6 }
  0xc2   :  { %v164_v34 = vpop.permute.xlu1 %163 }
  0xc3   :  { %v172_v36 = vsel %vm2214_vm5, %v164_v34, %v1591_v13  ;;  %v61_v51 = vpop.permute.xlu0 %60 }
  0xc4   :  { %184 = vst [vmem:[#allocation2 + $0x78] sm:$0xe] %v172_v36 }
  0xc6   :  { %v1600_v43 = vpop.permute.xlu1 %1599 }
  0xc7   :  { %v1602_v45 = vunpack.i.h.bf16 %v1600_v43  ;;  %v1601_v47 = vunpack.i.l.bf16 %v1600_v43 }
  0xc9   :  { %83 = vst.msk [vmem:[#allocation2 + $0x70] sm:$0x38] %vm79_vm13, %v1602_v45  ;;  %v70_v54 = vsel %vm2215_vm6, %v1601_v47, %v1602_v45  ;;  %v69_v55 = vsel %vm2216_vm7, %v61_v51, %v1601_v47 }
  0xca   :  { %82 = vst [vmem:[#allocation2 + $0x68] sm:$0x38] %v70_v54  ;;  %81 = vst [vmem:[#allocation2 + $0x60] sm:$0x38] %v69_v55 }
 0x160   :  { %v588_v56 = vpop.f32.mrf.mxu1 }
 0x161   :  { %v589_v58 = vadd.f32 %v588_v56, %v1960_v59 }
 0x162   :  { %v590_v5 = vpop.f32.mrf.mxu1 }
 0x163   :  { %v591_v7 = vadd.f32 %v590_v5, %v1960_v59  ;;  %v696_v29 = vmax.f32 %v589_v58, 0.0 }
 0x164   :  { %v594_v13 = vpop.f32.mrf.mxu1 }
 0x165   :  { %v697_v15 = vmax.f32 %v591_v7, 0.0  ;;  %v595_v30 = vadd.f32 %v594_v13, %v1979_v6 }
 0x166   :  { %v596_v32 = vpop.f32.mrf.mxu1 }
 0x167   :  { %v597_v33 = vadd.f32 %v596_v32, %v1979_v6  ;;  %789 = vmatprep.mubr.f32.mxu0 %v697_v15  ;;  %v699_v35 = vmax.f32 %v595_v30, 0.0  ;;  %v904_v15 = vld [vmem:[#allocation2 + $0x78] sm:$0xff]  ;;  %v906_v30 = vld [vmem:[#allocation2 + $0x88] sm:$0xff] }
 0x168   :  { %v600_v34 = vpop.f32.mrf.mxu1  ;;  %790 = vmatmul.mubr.f32.vlgmr.msra.gmra.mxu0 %v696_v29  ;;  %v901_v29 = vld [vmem:[#allocation2 + $0x60] sm:$0xff] }
 0x169   :  { %v700_v60 = vmax.f32 %v597_v33, 0.0  ;;  %1404 = vmatpush3.msra.mxu0 %v1743_v61  ;;  %v601_v36 = vadd.f32 %v600_v34, %v2005_v48 }
 0x16a   :  { %v602_v43 = vpop.f32.mrf.mxu1  ;;  %1405 = vmatprep.subr.mxu0 %v1753_v0 }
 0x16b   :  { %v603_v45 = vadd.f32 %v602_v43, %v2005_v48  ;;  %794 = vmatprep.mubr.f32.mxu0 %v700_v60  ;;  %1406 = vmatpush3.msra.mxu0 %v1758_v1  ;;  %v702_v54 = vmax.f32 %v601_v36, 0.0 }
 0x16c   :  { %v606_v47 = vpop.f32.mrf.mxu1  ;;  %795 = vmatmul.mubr.f32.gmra.mxu0 %v699_v35  ;;  %1407 = vmatprep.subr.mxu0 %v1764_v2 }
 0x16d   :  { %v703_v51 = vmax.f32 %v603_v45, 0.0  ;;  %1408 = vmatpush3.msra.mxu0 %v1770_v4  ;;  %v607_v61 = vadd.f32 %v606_v47, %v2014_v31 }
 0x16e   :  { %v608_v55 = vpop.f32.mrf.mxu1  ;;  %1409 = vmatprep.subr.mxu0 %v1776_v8 }
 0x16f   :  { %v609_v0 = vadd.f32 %v608_v55, %v2014_v31  ;;  %799 = vmatprep.mubr.f32.mxu0 %v703_v51  ;;  %1410 = vmatpush3.msra.mxu0 %v1783_v10  ;;  %v705_v2 = vmax.f32 %v607_v61, 0.0 }
 0x170   :  { %v1465_v56 = vpop.f32.mrf.mxu1  ;;  %800 = vmatmul.mubr.f32.gmra.mxu0 %v702_v54  ;;  %1411 = vmatprep.subr.mxu0 %v1789_v11 }
 0x171   :  { %v706_v1 = vmax.f32 %v609_v0, 0.0  ;;  %1412 = vmatpush3.msra.mxu0 %v1795_v12  ;;  %v683_v4 = vadd.f32 %v1465_v56, %v1979_v6 }
 0x172   :  { %v677_v58 = vpop.f32.mrf.mxu1  ;;  %1413 = vmatprep.subr.mxu0 %v1802_v14 }
 0x173   :  { %v678_v8 = vadd.f32 %v677_v58, %v1960_v59  ;;  %804 = vmatprep.mubr.f32.mxu0 %v706_v1  ;;  %1414 = vmatpush3.msra.mxu0 %v1809_v16  ;;  %v701_v11 = vmax.f32 %v683_v4, 0.0  ;;  %v910_v16 = vld [vmem:[#allocation2 + $0xa8] sm:$0x7] }
 0x174   :  { %v1468_v5 = vpop.f32.mrf.mxu1  ;;  %805 = vmatmul.mubr.f32.gmra.mxu0 %v705_v2  ;;  %1415 = vmatprep.subr.mxu0 %v1815_v17 }
 0x175   :  { %v698_v10 = vmax.f32 %v678_v8, 0.0  ;;  %1416 = vmatpush3.msra.mxu0 %v1821_v18  ;;  %v693_v12 = vadd.f32 %v1468_v5, %v2014_v31  ;;  %v908_v18 = vld [vmem:[#allocation2 + $0x98] sm:$0xff] }
 0x176   :  { %v687_v7 = vpop.f32.mrf.mxu1  ;;  %1417 = vmatprep.subr.mxu0 %v1828_v19  ;;  %v907_v19 = vld [vmem:[#allocation2 + $0x90] sm:$0xff] }
 0x177   :  { %v688_v14 = vadd.f32 %v687_v7, %v2005_v48  ;;  %1477 = vmatprep.mubr.msk.f32.mxu1 %vm708_vm8, %v698_v10  ;;  %1418 = vmatpush3.msra.mxu0 %v1835_v20  ;;  %v707_v13 = vmax.f32 %v693_v12, 0.0  ;;  %v905_v20 = vld [vmem:[#allocation2 + $0x80] sm:$0xff] }
 0x178   :  { %1478 = vmatmul.mubr.msk.f32.vlgmr.msra.gmra.mxu1 %vm708_vm8, %v701_v11  ;;  %1419 = vmatprep.subr.mxu0 %v1841_v21  ;;  %v902_v21 = vld [vmem:[#allocation2 + $0x68] sm:$0xff] }
 0x179   :  { %v704_v17 = vmax.f32 %v688_v14, 0.0  ;;  %1316 = vmatpush1.msk.msra.mxu1 %vm512_vm9, %v910_v16  ;;  %1420 = vmatpush3.msra.mxu0 %v1847_v22  ;;  %v912_v22 = vld [vmem:[#allocation2 + $0xb8] sm:$0x7] }
 0x17a   :  { %948 = vmatprep.subr.mxu1 %v908_v18  ;;  %1421 = vmatprep.subr.mxu0 %v1853_v23  ;;  %v909_v23 = vld [vmem:[#allocation2 + $0xa0] sm:$0xff] }
 0x17b   :  { %949 = vmatpush1.msra.mxu1 %v907_v19  ;;  %1480 = vmatprep.mubr.msk.f32.mxu1 %vm708_vm8, %v704_v17 }
 0x17c   :  { %950 = vmatprep.subr.mxu1 %v905_v20  ;;  %1481 = vmatmul.mubr.msk.f32.gmra.mxu1 %vm708_vm8, %v707_v13 }
 0x17d   :  { %951 = vmatpush1.msra.mxu1 %v904_v15  ;;  %986 = vmatprep.mubr.f32.mxu1 %v1610_v3 }
 0x17e   :  { %952 = vmatprep.subr.mxu1 %v902_v21  ;;  %1422 = vmatpush3.msra.mxu0 %v1859_v24  ;;  %v903_v24 = vld [vmem:[#allocation2 + $0x70] sm:$0xff] }
 0x17f   :  { %953 = vmatpush1.msra.mxu1 %v901_v29  ;;  %1423 = vmatprep.subr.mxu0 %v1865_v25 }
 0x180   :  { %1483 = vmatprep.subr.msk.mxu1 %vm512_vm9, %v912_v22  ;;  %1317 = vmatmul.mubr.msk.f32.vlgmr.msra.gmra.mxu1 %vm499_vm14, %v1919_v46 }
 0x181   :  { %1484 = vmatpush3.msk.msra.mxu1 %vm512_vm9, %v912_v22  ;;  %992 = vmatprep.mubr.f32.mxu1 %v1610_v3  ;;  %vm895_vm9 = vcmask 523264  }
 0x182   :  { %1485 = vmatprep.subr.mxu1 %v909_v23  ;;  %1424 = vmatpush3.msra.mxu0 %v1871_v26 }
 0x183   :  { %1486 = vmatpush3.msra.mxu1 %v909_v23  ;;  %1425 = vmatprep.subr.mxu0 %v1877_v27 }
 0x184   :  { %1487 = vmatprep.subr.mxu1 %v906_v30  ;;  %1318 = vmatmul.mubr.msk.f32.gmra.mxu1 %vm499_vm14, %v1929_v49 }
 0x185   :  { %1488 = vmatpush3.msra.mxu1 %v906_v30  ;;  %998 = vmatprep.mubr.f32.mxu1 %v1610_v3 }
 0x186   :  { %1489 = vmatprep.subr.mxu1 %v903_v24  ;;  %1426 = vmatpush3.msra.mxu0 %v1883_v28 }
 0x187   :  { %1490 = vmatpush3.msra.mxu1 %v903_v24  ;;  %1427 = vmatprep.subr.mxu0 %v2022_v37 }
 0x188   :  { %1319 = vmatmul.mubr.msk.f32.gmra.mxu1 %vm499_vm14, %v1937_v52  ;;  %1428 = vmatpush3.msra.mxu0 %v2028_v38 }
 0x189   :  { %1004 = vmatprep.mubr.f32.mxu1 %v1610_v3  ;;  %1429 = vmatprep.subr.mxu0 %v2034_v39 }
 0x18a   :  { %1430 = vmatpush3.msra.mxu0 %v2040_v40  ;;  %1497 = vmatprep.subr.msk.mxu1 %vm721_vm11, %v1942_v53 }
 0x18b   :  { %1431 = vmatprep.subr.mxu0 %v2046_v41 }
 0x18c   :  { %1320 = vmatmul.mubr.msk.f32.gmra.mxu1 %vm499_vm14, %v1952_v57  ;;  %1432 = vmatpush3.msra.mxu0 %v2052_v42 }
 0x18d   :  { %1491 = vmatprep.mubr.msk.f32.mxu1 %vm499_vm14, %v1919_v46  ;;  %1433 = vmatprep.subr.mxu0 %v2058_v44 }
 0x18e   :  { %1434 = vmatpush3.msra.mxu0 %v2064_v50 }
 0x190   :  { %1492 = vmatmul.mubr.msk.f32.vlgmr.msra.gmra.mxu1 %vm499_vm14, %v1929_v49 }
 0x191   :  { %1494 = vmatprep.mubr.msk.f32.mxu1 %vm499_vm14, %v1937_v52  ;;  %1498 = vmatpush3.msk.msra.mxu1 %vm721_vm11, %v1942_v53 }
 0x192   :  { %1499 = vmatprep.subr.mxu1 %v1965_v62 }
 0x193   :  { %1500 = vmatpush3.msra.mxu1 %v1965_v62 }
 0x194   :  { %1495 = vmatmul.mubr.msk.f32.gmra.mxu1 %vm499_vm14, %v1952_v57  ;;  %1501 = vmatprep.subr.mxu1 %v1976_v63 }
 0x195   :  { %1502 = vmatpush3.msra.mxu1 %v1976_v63 }
 0x196   :  { %1503 = vmatprep.subr.mxu1 %v1986_v9 }
 0x197   :  { %1504 = vmatpush3.msra.mxu1 %v1986_v9 }
 0x228   :  { %v1375_v3 = vpop.f32.mrf.mxu0 }
 0x22a   :  { %v1376_v25 = vpop.f32.mrf.mxu0 }
 0x22b   :  { %v1377_v57 = vadd.f32 %v1376_v25, %v1375_v3 }
 0x22c   :  { %v1378_v26 = vpop.f32.mrf.mxu0 }
 0x22e   :  { %v1379_v27 = vpop.f32.mrf.mxu0 }
 0x22f   :  { %v1380_v52 = vadd.f32 %v1379_v27, %v1378_v26 }
 0x230   :  { %v1381_v28 = vpop.f32.mrf.mxu0 }
 0x232   :  { %v1382_v46 = vpop.f32.mrf.mxu0 }
 0x233   :  { %v1383_v40 = vadd.f32 %v1382_v46, %v1381_v28 }
 0x234   :  { %v1384_v49 = vpop.f32.mrf.mxu0 }
 0x236   :  { %v1385_v53 = vpop.f32.mrf.mxu0 }
 0x237   :  { %v1386_v39 = vadd.f32 %v1385_v53, %v1384_v49 }
 0x238   :  { %v1479_v62 = vpop.f32.mrf.mxu1 }
 0x239   :  { %v882_v37 = vadd.f32 %v1479_v62, %v1380_v52 }
 0x23a   :  { %v876_v38 = vpop.f32.mrf.mxu1 }
 0x23b   :  { %897 = vst.msk [vmem:[%s2203_s4 + $0x8] sm:$0xff] %vm895_vm9, %v882_v37  ;;  %v877_v63 = vadd.f32 %v1377_v57, %v876_v38 }
 0x23c   :  { %v1482_v9 = vpop.f32.mrf.mxu1 }
 0x23d   :  { %896 = vst.msk [vmem:[%s2203_s4] sm:$0xff] %vm895_vm9, %v877_v63  ;;  %v892_v41 = vadd.f32 %v1482_v9, %v1386_v39 }
 0x23e   :  { %v886_v42 = vpop.f32.mrf.mxu1 }
 0x23f   :  { %899 = vst.msk [vmem:[%s2203_s4 + $0x18] sm:$0xff] %vm895_vm9, %v892_v41  ;;  %v887_v44 = vadd.f32 %v1383_v40, %v886_v42 }
 0x240   :  { %v988_v50 = vpop.f32.mrf.mxu1 }
 0x241   :  { %898 = vst.msk [vmem:[%s2203_s4 + $0x10] sm:$0xff] %vm895_vm9, %v887_v44  ;;  %v989_v32 = vadd.f32 %v988_v50, %v1960_v59 }
 0x242   :  { %v990_v33 = vpop.f32.mrf.mxu1 }
 0x243   :  { %v991_v34 = vadd.f32 %v990_v33, %v1960_v59  ;;  %v1096_v36 = vmax.f32 %v989_v32, 0.0 }
 0x244   :  { %v994_v60 = vpop.f32.mrf.mxu1 }
 0x245   :  { %v1097_v35 = vmax.f32 %v991_v34, 0.0  ;;  %v995_v43 = vadd.f32 %v994_v60, %v1979_v6 }
 0x246   :  { %v996_v45 = vpop.f32.mrf.mxu1 }
 0x247   :  { %v997_v47 = vadd.f32 %v996_v45, %v1979_v6  ;;  %1184 = vmatprep.mubr.f32.mxu0 %v1097_v35  ;;  %v1099_v61 = vmax.f32 %v995_v43, 0.0 }
 0x248   :  { %v1000_v51 = vpop.f32.mrf.mxu1  ;;  %1185 = vmatmul.mubr.f32.vlgmr.msra.gmra.mxu0 %v1096_v36 }
 0x249   :  { %v1100_v54 = vmax.f32 %v997_v47, 0.0  ;;  %v1001_v55 = vadd.f32 %v1000_v51, %v2005_v48 }
 0x24a   :  { %v1002_v0 = vpop.f32.mrf.mxu1 }
 0x24b   :  { %v1003_v56 = vadd.f32 %v1002_v0, %v2005_v48  ;;  %1189 = vmatprep.mubr.f32.mxu0 %v1100_v54  ;;  %v1102_v4 = vmax.f32 %v1001_v55, 0.0 }
 0x24c   :  { %v1006_v1 = vpop.f32.mrf.mxu1  ;;  %1190 = vmatmul.mubr.f32.gmra.mxu0 %v1099_v61 }
 0x24d   :  { %v1103_v2 = vmax.f32 %v1003_v56, 0.0  ;;  %v1007_v58 = vadd.f32 %v1006_v1, %v2014_v31 }
 0x24e   :  { %v1008_v8 = vpop.f32.mrf.mxu1 }
 0x24f   :  { %v1009_v5 = vadd.f32 %v1008_v8, %v2014_v31  ;;  %1194 = vmatprep.mubr.f32.mxu0 %v1103_v2  ;;  %v1105_v12 = vmax.f32 %v1007_v58, 0.0 }
 0x250   :  { %v1493_v10 = vpop.f32.mrf.mxu1  ;;  %1195 = vmatmul.mubr.f32.gmra.mxu0 %v1102_v4 }
 0x251   :  { %v1106_v11 = vmax.f32 %v1009_v5, 0.0  ;;  %v1083_v7 = vadd.f32 %v1493_v10, %v1979_v6 }
 0x252   :  { %v1077_v14 = vpop.f32.mrf.mxu1 }
 0x253   :  { %v1078_v16 = vadd.f32 %v1077_v14, %v1960_v59  ;;  %1199 = vmatprep.mubr.f32.mxu0 %v1106_v11  ;;  %v1101_v13 = vmax.f32 %v1083_v7, 0.0 }
 0x254   :  { %v1496_v17 = vpop.f32.mrf.mxu1  ;;  %1200 = vmatmul.mubr.f32.gmra.mxu0 %v1105_v12 }
 0x255   :  { %v1098_v18 = vmax.f32 %v1078_v16, 0.0  ;;  %v1093_v19 = vadd.f32 %v1496_v17, %v2014_v31 }
 0x256   :  { %v1087_v20 = vpop.f32.mrf.mxu1 }
 0x257   :  { %v1088_v15 = vadd.f32 %v1087_v20, %v2005_v48  ;;  %1505 = vmatprep.mubr.msk.f32.mxu1 %vm708_vm8, %v1098_v18  ;;  %v1107_v29 = vmax.f32 %v1093_v19, 0.0 }
 0x258   :  { %1506 = vmatmul.mubr.msk.f32.vlgmr.msra.gmra.mxu1 %vm708_vm8, %v1101_v13 }
 0x259   :  { %v1104_v21 = vmax.f32 %v1088_v15, 0.0 }
 0x25b   :  { %1508 = vmatprep.mubr.msk.f32.mxu1 %vm708_vm8, %v1104_v21 }
 0x25c   :  { %1509 = vmatmul.mubr.msk.f32.gmra.mxu1 %vm708_vm8, %v1107_v29 }
 0x308   :  { %v1435_v59 = vpop.f32.mrf.mxu0 }
 0x30a   :  { %v1436_v6 = vpop.f32.mrf.mxu0 }
 0x30b   :  { %v1437_v26 = vadd.f32 %v1436_v6, %v1435_v59 }
 0x30c   :  { %v1438_v22 = vpop.f32.mrf.mxu0 }
 0x30e   :  { %v1439_v23 = vpop.f32.mrf.mxu0 }
 0x30f   :  { %v1440_v3 = vadd.f32 %v1439_v23, %v1438_v22 }
 0x310   :  { %v1441_v30 = vpop.f32.mrf.mxu0 }
 0x312   :  { %v1442_v24 = vpop.f32.mrf.mxu0 }
 0x313   :  { %v1443_v53 = vadd.f32 %v1442_v24, %v1441_v30 }
 0x314   :  { %v1444_v31 = vpop.f32.mrf.mxu0 }
 0x316   :  { %v1445_v25 = vpop.f32.mrf.mxu0 }
 0x317   :  { %v1446_v46 = vadd.f32 %v1445_v25, %v1444_v31 }
 0x318   :  { %v1507_v48 = vpop.f32.mrf.mxu1 }
 0x319   :  { %v1277_v27 = vadd.f32 %v1507_v48, %v1440_v3 }
 0x31a   :  { %v1271_v28 = vpop.f32.mrf.mxu1 }
 0x31b   :  { %1332 = vst.msk [vmem:[%s2203_s4 + $0x28] sm:$0xff] %vm895_vm9, %v1277_v27  ;;  %v1272_v49 = vadd.f32 %v1437_v26, %v1271_v28 }
 0x31c   :  { %v1510_v52 = vpop.f32.mrf.mxu1 }
 0x31d   :  { %1331 = vst.msk [vmem:[%s2203_s4 + $0x20] sm:$0xff] %vm895_vm9, %v1272_v49  ;;  %v1287_v62 = vadd.f32 %v1510_v52, %v1446_v46 }
 0x31e   :  { %v1281_v57 = vpop.f32.mrf.mxu1 }
 0x31f   :  { %1334 = vst.msk [vmem:[%s2203_s4 + $0x38] sm:$0xff] %vm895_vm9, %v1287_v62  ;;  %v1282_v37 = vadd.f32 %v1443_v53, %v1281_v57 }
 0x321   :  { %1333 = vst.msk [vmem:[%s2203_s4 + $0x30] sm:$0xff] %vm895_vm9, %v1282_v37 }

</bundles_post_ra>
